<compile_context>
chip_gen: v5e
topology: v5e:2x2
jax: 0.10.0
libtpu: 0.0.40
codegen_flags: <defaults>
</compile_context>

<pallas_src>
import functools

import jax
import jax.numpy as jnp
from jax import lax
from jax.experimental import pallas as pl
from jax.experimental.pallas import tpu as pltpu

Q1 = 0.1
Q9 = 1.0 - Q1
# The fused per-element form assumes Q1 + Q9 == 1 exactly:
#   loss10 + loss90 = (Q1+Q9)*d - (Q9-Q1)*v - min(d+v,0) - min(d-v,0)
# (uses max(q*r, (q-1)*r) == q*r - min(r, 0)).  If the quantiles ever become
# independent, the (Q1+Q9)*d coefficient must be reinstated.
assert abs((Q1 + Q9) - 1.0) < 1e-12
_QDIFF = Q9 - Q1  # 0.8


def _cdiv(a, b):
    return -(-a // b)


def _to_f32(x):
    return x if x.dtype == jnp.float32 else x.astype(jnp.float32)


def _default_num_slices():
    """One accumulator slice per TensorCore (v7x megacore). Fallback: 2."""
    try:
        info = pltpu.get_tpu_info()
        for attr in ("num_cores", "core_count", "num_tensorcores",
                     "tensorcore_count"):
            v = getattr(info, attr, None)
            if v is not None:
                v = int(v)
                if 0 < v <= 8:
                    return v
    except Exception:
        pass
    return 2


def _pinball_kernel(o_ref, t_ref, v_ref, out_ref, *,
                    blocks_per_slice, block_g, g_valid, exact):
    """out_ref (1, sub, 128) is the per-slice f32 accumulator (resident in j)."""
    s = pl.program_id(0)
    j = pl.program_id(1)

    @pl.when(j == 0)
    def _():
        out_ref[...] = jnp.zeros_like(out_ref)

    o = _to_f32(o_ref[...])
    t = _to_f32(t_ref[...])
    v = _to_f32(v_ref[...])

    d = t - o
    # loss_10 + loss_90 == d - (Q9 - Q1)*v - min(d + v, 0) - min(d - v, 0)
    val = d - _QDIFF * v - jnp.minimum(d + v, 0.0) - jnp.minimum(d - v, 0.0)

    if exact:
        # Every block fully valid: single fused per-lane partial sum (VPU only).
        out_ref[0] += jnp.sum(val, axis=0)
    else:
        blk = s * blocks_per_slice + j           # un-clamped global block idx
        n_full_blocks = g_valid // block_g       # blocks with every group valid

        @pl.when(blk < n_full_blocks)
        def _():
            # Hot path: unmasked.
            out_ref[0] += jnp.sum(val, axis=0)

        @pl.when(blk >= n_full_blocks)
        def _():
            # Boundary / overshoot block: group-level mask zeroes stale VMEM
            # rows (partial edge DMA) and clamped duplicate reads.  The
            # sub-group element tail is zero-padded in the wrapper and
            # contributes exactly 0, so element-level masking is unnecessary.
            gid = blk * block_g + lax.broadcasted_iota(jnp.int32, val.shape, 0)
            out_ref[0] += jnp.sum(jnp.where(gid < g_valid, val, 0.0), axis=0)


def pinball_loss(output_o, target_o, var_o, *,
                 tile_bytes=2 * 1024 * 1024,      # per input, per pipeline buf
                 num_slices=None,
                 vmem_limit_bytes=48 * 1024 * 1024):
    """mean(loss_10) + mean(loss_90), matching the PyTorch PinBallLoss."""
    assert output_o.shape == target_o.shape == var_o.shape
    n = int(output_o.size)

    dtype = jnp.promote_types(jnp.promote_types(output_o.dtype, target_o.dtype),
                              var_o.dtype)
    itemsize = jnp.dtype(dtype).itemsize
    lanes = 128
    sub = 8 * max(1, 4 // itemsize)    # dtype-native sublane tile: f32=8, bf16=16
    group = sub * lanes                # elements per (sub, 128) group

    g_valid = _cdiv(n, group)                                  # valid groups
    block_g = max(1, min(tile_bytes // (group * itemsize), g_valid))
    if num_slices is None:
        num_slices = _default_num_slices()
    # Never let slicing shrink the block; shrink the slice count instead.
    num_slices = max(1, min(num_slices, _cdiv(g_valid, block_g)))
    blocks_per_slice = _cdiv(g_valid, num_slices * block_g)
    g_cover = num_slices * blocks_per_slice * block_g
    exact = (g_cover == g_valid)

    def prep(x):
        x = x.reshape(-1)
        if x.dtype != dtype:
            x = x.astype(dtype)
        pad = g_valid * group - n
        if pad:
            # Zero padding contributes exactly 0 to the pinball sum.
            # TODO(synk): jnp.pad copies the whole array; an in-kernel masked
            # tail over the raw flat buffer would avoid the copy for large
            # non-group-aligned inputs.  (The pad itself is < one group.)
            x = jnp.pad(x, (0, pad))
        return x.reshape(g_valid, sub, lanes)

    o3, t3, v3 = prep(output_o), prep(target_o), prep(var_o)

    last_block = _cdiv(g_valid, block_g) - 1

    def in_map(s, j):
        # Clamp so overshoot blocks never DMA out of bounds; the kernel masks
        # their (duplicated) contribution to zero.
        return (jnp.minimum(s * blocks_per_slice + j, last_block), 0, 0)

    in_spec = pl.BlockSpec((block_g, sub, lanes), in_map)
    out_spec = pl.BlockSpec((1, sub, lanes), lambda s, j: (s, 0, 0))

    kernel = functools.partial(
        _pinball_kernel,
        blocks_per_slice=blocks_per_slice,
        block_g=block_g,
        g_valid=g_valid,
        exact=exact,
    )

    cost = pl.CostEstimate(
        flops=9 * n,
        transcendentals=0,
        bytes_accessed=3 * n * itemsize + num_slices * group * 4,
    )

    partials = pl.pallas_call(
        kernel,
        out_shape=jax.ShapeDtypeStruct((num_slices, sub, lanes), jnp.float32),
        grid_spec=pltpu.PrefetchScalarGridSpec(
            num_scalar_prefetch=0,
            grid=(num_slices, blocks_per_slice),
            in_specs=[in_spec, in_spec, in_spec],
            out_specs=out_spec,
        ),
        compiler_params=pltpu.CompilerParams(
            # TODO(synk): on v7x verify with xprof that the leading axis really
            # shards across both TensorCores; if not, switch this axis to
            # pltpu.CORE_PARALLEL (or an explicit core_map split).
            dimension_semantics=("parallel", "arbitrary"),
            vmem_limit_bytes=vmem_limit_bytes,
        ),
        cost_estimate=cost,
    )(o3, t3, v3)

    # Tiny final reduction (num_slices * sub * 128 elems) + mean normalization.
    return jnp.sum(partials) / n


def pinball_loss_ref(output_o, target_o, var_o):
    output_o = _to_f32(output_o)
    target_o = _to_f32(target_o)
    var_o = _to_f32(var_o)
    q_10 = target_o - (output_o - var_o)
    q_90 = target_o - (output_o + var_o)
    loss_10 = jnp.maximum(Q1 * q_10, (Q1 - 1.0) * q_10)
    loss_90 = jnp.maximum(Q9 * q_90, (Q9 - 1.0) * q_90)
    return jnp.mean(loss_10) + jnp.mean(loss_90)


if __name__ == "__main__":
    # 1) Aligned NCHW input (2, 4, 16, 16) -> 2048 elements (exact coverage).
    k1, k2, k3 = jax.random.split(jax.random.PRNGKey(0), 3)
    shape = (2, 4, 16, 16)
    output_o = jax.random.normal(k1, shape, dtype=jnp.float32)
    target_o = jax.random.normal(k2, shape, dtype=jnp.float32)
    var_o = jnp.abs(jax.random.normal(k3, shape, dtype=jnp.float32))

    loss = pinball_loss(output_o, target_o, var_o)
    jax.block_until_ready(loss)
    ref = pinball_loss_ref(output_o, target_o, var_o)
    assert jnp.allclose(loss, ref, rtol=1e-5, atol=1e-6), (loss, ref)

    # 2) Ragged input (sub-group zero-pad path), (2, 3, 17, 13) -> 1326 elems.
    k4, k5, k6 = jax.random.split(jax.random.PRNGKey(1), 3)
    rshape = (2, 3, 17, 13)
    ro = jax.random.normal(k4, rshape, dtype=jnp.float32)
    rt = jax.random.normal(k5, rshape, dtype=jnp.float32)
    rv = jnp.abs(jax.random.normal(k6, rshape, dtype=jnp.float32))

    rloss = pinball_loss(ro, rt, rv)
    jax.block_until_ready(rloss)
    rref = pinball_loss_ref(ro, rt, rv)
    assert jnp.allclose(rloss, rref, rtol=1e-5, atol=1e-6), (rloss, rref)

    # 3) Non-exact grid coverage (boundary-mask path): 5120 elems, tiny tiles.
    k7, k8, k9 = jax.random.split(jax.random.PRNGKey(2), 3)
    mshape = (5, 4, 16, 16)
    mo = jax.random.normal(k7, mshape, dtype=jnp.float32)
    mt = jax.random.normal(k8, mshape, dtype=jnp.float32)
    mv = jnp.abs(jax.random.normal(k9, mshape, dtype=jnp.float32))

    mloss = pinball_loss(mo, mt, mv, tile_bytes=2 * 1024 * 4)  # block_g = 2
    jax.block_until_ready(mloss)
    mref = pinball_loss_ref(mo, mt, mv)
    assert jnp.allclose(mloss, mref, rtol=1e-5, atol=1e-6), (mloss, mref)

    # 4) bf16 inputs (dtype-aware (16,128) sublane tiling, halved HBM bytes).
    bo = output_o.astype(jnp.bfloat16)
    bt = target_o.astype(jnp.bfloat16)
    bv = var_o.astype(jnp.bfloat16)
    bloss = pinball_loss(bo, bt, bv)
    jax.block_until_ready(bloss)
    bref = pinball_loss_ref(bo, bt, bv)
    assert jnp.allclose(bloss, bref, rtol=1e-5, atol=1e-6), (bloss, bref)

    print("KERNEL_OK")
</pallas_src>

<mosaic_0001>
module attributes {stable_mosaic.version = 11 : i64} {
  func.func @_pinball_kernel(%arg0: i32, %arg1: i32, %arg2: memref<2x8x128xf32, #tpu.memory_space<vmem>>, %arg3: memref<2x8x128xf32, #tpu.memory_space<vmem>>, %arg4: memref<2x8x128xf32, #tpu.memory_space<vmem>>, %arg5: memref<1x8x128xf32, #tpu.memory_space<vmem>>) attributes {dimension_semantics = [#tpu.dimension_semantics<parallel>, #tpu.dimension_semantics<arbitrary>], iteration_bounds = array<i64: 1, 1>, scalar_prefetch = 0 : i64, scratch_operands = 0 : i64, tpu.core_type = #tpu.core_type<tc>, window_params = [{transform_indices = @transform_0, window_bounds = array<i64: 2, 8, 128>}, {transform_indices = @transform_1, window_bounds = array<i64: 2, 8, 128>}, {transform_indices = @transform_2, window_bounds = array<i64: 2, 8, 128>}, {transform_indices = @transform_3, window_bounds = array<i64: 1, 8, 128>}]} {
    %c0_i32 = arith.constant 0 : i32
    %0 = arith.cmpi eq, %arg1, %c0_i32 : i32
    %1 = arith.extui %0 : i1 to i32
    %c0_i32_0 = arith.constant 0 : i32
    %2 = arith.cmpi ne, %1, %c0_i32_0 : i32
    scf.if %2 {
      %cst_18 = arith.constant 0.000000e+00 : f32
      %25 = vector.broadcast %cst_18 : f32 to vector<1x8x128xf32>
      %c0_19 = arith.constant 0 : index
      %c0_20 = arith.constant 0 : index
      %c0_21 = arith.constant 0 : index
      %26 = vector.load %arg5[%c0_19, %c0_20, %c0_21] : memref<1x8x128xf32, #tpu.memory_space<vmem>>, vector<1x8x128xf32>
      tpu.vector_store %arg5[%c0_19, %c0_20, %c0_21], %25 {strides = array<i32>} : memref<1x8x128xf32, #tpu.memory_space<vmem>>, vector<1x8x128xf32>,
    } else {
    }
    %c0 = arith.constant 0 : index
    %c0_1 = arith.constant 0 : index
    %c0_2 = arith.constant 0 : index
    %3 = vector.load %arg2[%c0, %c0_1, %c0_2] : memref<2x8x128xf32, #tpu.memory_space<vmem>>, vector<2x8x128xf32>
    %c0_3 = arith.constant 0 : index
    %c0_4 = arith.constant 0 : index
    %c0_5 = arith.constant 0 : index
    %4 = vector.load %arg3[%c0_3, %c0_4, %c0_5] : memref<2x8x128xf32, #tpu.memory_space<vmem>>, vector<2x8x128xf32>
    %c0_6 = arith.constant 0 : index
    %c0_7 = arith.constant 0 : index
    %c0_8 = arith.constant 0 : index
    %5 = vector.load %arg4[%c0_6, %c0_7, %c0_8] : memref<2x8x128xf32, #tpu.memory_space<vmem>>, vector<2x8x128xf32>
    %6 = arith.subf %4, %3 : vector<2x8x128xf32>
    %cst = arith.constant 8.000000e-01 : f32
    %7 = vector.broadcast %cst : f32 to vector<2x8x128xf32>
    %8 = arith.mulf %7, %5 : vector<2x8x128xf32>
    %9 = arith.subf %6, %8 : vector<2x8x128xf32>
    %10 = arith.addf %6, %5 : vector<2x8x128xf32>
    %cst_9 = arith.constant 0.000000e+00 : f32
    %11 = vector.broadcast %cst_9 : f32 to vector<2x8x128xf32>
    %12 = arith.minimumf %10, %11 : vector<2x8x128xf32>
    %13 = arith.subf %9, %12 : vector<2x8x128xf32>
    %14 = arith.subf %6, %5 : vector<2x8x128xf32>
    %cst_10 = arith.constant 0.000000e+00 : f32
    %15 = vector.broadcast %cst_10 : f32 to vector<2x8x128xf32>
    %16 = arith.minimumf %14, %15 : vector<2x8x128xf32>
    %17 = arith.subf %13, %16 : vector<2x8x128xf32>
    %c0_11 = arith.constant 0 : index
    %c0_12 = arith.constant 0 : index
    %c0_13 = arith.constant 0 : index
    %18 = vector.load %arg5[%c0_11, %c0_12, %c0_13] : memref<1x8x128xf32, #tpu.memory_space<vmem>>, vector<1x8x128xf32>
    %19 = vector.shape_cast %18 : vector<1x8x128xf32> to vector<8x128xf32>
    %cst_14 = arith.constant dense<0.000000e+00> : vector<8x128xf32>
    %20 = vector.multi_reduction <add>, %17, %cst_14 [0] : vector<2x8x128xf32> to vector<8x128xf32>
    %21 = arith.addf %19, %20 : vector<8x128xf32>
    %c0_15 = arith.constant 0 : index
    %c0_16 = arith.constant 0 : index
    %c0_17 = arith.constant 0 : index
    %22 = vector.load %arg5[%c0_15, %c0_16, %c0_17] : memref<1x8x128xf32, #tpu.memory_space<vmem>>, vector<1x8x128xf32>
    %23 = vector.shape_cast %22 : vector<1x8x128xf32> to vector<8x128xf32>
    %24 = vector.shape_cast %21 : vector<8x128xf32> to vector<1x8x128xf32>
    tpu.vector_store %arg5[%c0_15, %c0_16, %c0_17], %24 {strides = array<i32>} : memref<1x8x128xf32, #tpu.memory_space<vmem>>, vector<1x8x128xf32>,
    return
  }
  func.func @transform_0(%arg0: i32, %arg1: i32) -> (i32, i32, i32) {
    %c1_i32 = arith.constant 1 : i32
    %0 = arith.muli %arg0, %c1_i32 : i32
    %1 = arith.addi %0, %arg1 : i32
    %c0_i32 = arith.constant 0 : i32
    %2 = arith.minsi %1, %c0_i32 : i32
    %c0_i32_0 = arith.constant 0 : i32
    %c0_i32_1 = arith.constant 0 : i32
    %c0_i32_2 = arith.constant 0 : i32
    return %2, %c0_i32_0, %c0_i32_1 : i32, i32, i32
  }
  func.func @transform_1(%arg0: i32, %arg1: i32) -> (i32, i32, i32) {
    %c1_i32 = arith.constant 1 : i32
    %0 = arith.muli %arg0, %c1_i32 : i32
    %1 = arith.addi %0, %arg1 : i32
    %c0_i32 = arith.constant 0 : i32
    %2 = arith.minsi %1, %c0_i32 : i32
    %c0_i32_0 = arith.constant 0 : i32
    %c0_i32_1 = arith.constant 0 : i32
    %c0_i32_2 = arith.constant 0 : i32
    return %2, %c0_i32_0, %c0_i32_1 : i32, i32, i32
  }
  func.func @transform_2(%arg0: i32, %arg1: i32) -> (i32, i32, i32) {
    %c1_i32 = arith.constant 1 : i32
    %0 = arith.muli %arg0, %c1_i32 : i32
    %1 = arith.addi %0, %arg1 : i32
    %c0_i32 = arith.constant 0 : i32
    %2 = arith.minsi %1, %c0_i32 : i32
    %c0_i32_0 = arith.constant 0 : i32
    %c0_i32_1 = arith.constant 0 : i32
    %c0_i32_2 = arith.constant 0 : i32
    return %2, %c0_i32_0, %c0_i32_1 : i32, i32, i32
  }
  func.func @transform_3(%arg0: i32, %arg1: i32) -> (i32, i32, i32) {
    %c0_i32 = arith.constant 0 : i32
    %c0_i32_0 = arith.constant 0 : i32
    %c0_i32_1 = arith.constant 0 : i32
    return %arg0, %c0_i32, %c0_i32_0 : i32, i32, i32
  }
}

</mosaic_0001>

<bundles_post_ra>
// kernel: tpu_custom_call.1
= control target key start
LH: loop header
LB: loop body
LE: loop exit
PB: predicated region body
PF: predicated region fallthrough
CT: control target
= control target key end

     0   :  { %8 = vsyncpa [#allocation3], 0  ;;  %s296_s0 = inlined_call_operand.hbm [shape: f32[2,8,128], index: 0, kind: input, shape index: {}]   ;;  %s297_s1 = inlined_call_operand.hbm [shape: f32[2,8,128], index: 1, kind: input, shape index: {}]   ;;  %s298_s2 = inlined_call_operand.hbm [shape: f32[2,8,128], index: 2, kind: input, shape index: {}]   ;;  %s299_s3 = inlined_call_operand.hbm [shape: f32[1,8,128], index: 3, kind: output, shape index: {}]  }
   0x1   :  { %9 = vsyncpa [#allocation6], 0 }
   0x2   :  { %10 = vsyncpa [#allocation4], 0  ;;  %s40_s14 = sshll.u32 %s297_s1, 4  ;;  %s258_s15 = smov [#allocation5]   ;;  %s41_s14 = int_to_ptr.hbm [resolvable:$true] %s40_s14 }
   0x3   :  { %s42_s16 = sshll.u32 %s258_s15, 4  ;;  %s21_s19 = sshll.u32 %s296_s0, 4  ;;  %s43_s16 = int_to_ptr.vmem [resolvable:$true] %s42_s16  ;;  %s22_s19 = int_to_ptr.hbm [resolvable:$true] %s21_s19 }
   0x4   :  { %s259_s20 = smov 128   ;;  %s260_s21 = smov 8  }
   0x5   :  { %48 = dma.hbm_to_vmem [thread:$0]  %s41_s14, 256, %s43_s16, [#allocation6], %s259_s20, %s259_s20, %s260_s21  }
   0x6   :  { %s261_s22 = smov [#allocation2]   ;;  %s59_s26 = sshll.u32 %s298_s2, 4  ;;  %s60_s26 = int_to_ptr.hbm [resolvable:$true] %s59_s26 }
   0x7   :  { %s23_s23 = sshll.u32 %s261_s22, 4  ;;  %s262_s1 = smov [#allocation7]   ;;  %s24_s23 = int_to_ptr.vmem [resolvable:$true] %s23_s23 }
   0x8   :  { %29 = dma.hbm_to_vmem [thread:$0]  %s22_s19, 256, %s24_s23, [#allocation3], %s259_s20, %s259_s20, %s260_s21  }
   0x9   :  { %s61_s27 = sshll.u32 %s262_s1, 4  ;;  %s62_s27 = int_to_ptr.vmem [resolvable:$true] %s61_s27 }
   0xa   :  { %67 = dma.hbm_to_vmem [thread:$0]  %s60_s26, 256, %s62_s27, [#allocation6], %s259_s20, %s259_s20, %s260_s21  }
   0xb   :  { %252 = dma.done.wait [#allocation3], 256  }
   0xc   :  { %253 = vsyncadd [#allocation3], 4294967040 }
   0xd   :  { %254 = dma.done.wait [#allocation6], 512  }
   0xe   :  { %255 = vsyncadd [#allocation6], 4294966784  ;;  %v97_v0 = vld [vmem:[#allocation2] sm:$0xff]  ;;  %v98_v1 = vld [vmem:[#allocation2 + $0x8] sm:$0xff]  ;;  %s263_s0 = smov [#allocation8]   ;;  %s132_s30 = sshll.u32 %s299_s3, 4  ;;  %s133_s30 = int_to_ptr.hbm [resolvable:$true] %s132_s30 }
   0xf   :  { %v99_v2 = vld [vmem:[#allocation5] sm:$0xff]  ;;  %v100_v3 = vld [vmem:[#allocation5 + $0x8] sm:$0xff]  ;;  %v101_v4 = vld [vmem:[#allocation7] sm:$0xff]  ;;  %s130_s2 = sshll.u32 %s263_s0, 4  ;;  %s131_s2 = int_to_ptr.vmem [resolvable:$true] %s130_s2 }
  0x10   :  { %v102_v5 = vld [vmem:[#allocation7 + $0x8] sm:$0xff]  ;;  %v103_v6 = vsub.f32 %v99_v2, %v97_v0  ;;  %v104_v7 = vsub.f32 %v100_v3, %v98_v1  ;;  %v105_v8 = vmul.f32 0.8, %v101_v4 }
  0x11   :  { %v106_v9 = vmul.f32 0.8, %v102_v5 }
  0x12   :  { %v109_v10 = vadd.f32 %v103_v6, %v101_v4  ;;  %v115_v11 = vsub.f32 %v103_v6, %v101_v4  ;;  %v107_v12 = vsub.f32 %v103_v6, %v105_v8  ;;  %v110_v14 = vadd.f32 %v104_v7, %v102_v5 }
  0x13   :  { %v108_v13 = vsub.f32 %v104_v7, %v106_v9  ;;  %v116_v15 = vsub.f32 %v104_v7, %v102_v5 }
  0x14   :  { %v111_v16 = vmin.f32 %v109_v10, 0.0  ;;  %v117_v17 = vmin.f32 %v115_v11, 0.0  ;;  %v112_v18 = vmin.f32 %v110_v14, 0.0 }
  0x15   :  { %v118_v19 = vmin.f32 %v116_v15, 0.0 }
  0x16   :  { %v113_v20 = vsub.f32 %v107_v12, %v111_v16  ;;  %v114_v21 = vsub.f32 %v108_v13, %v112_v18 }
  0x18   :  { %v119_v22 = vsub.f32 %v113_v20, %v117_v17  ;;  %v120_v23 = vsub.f32 %v114_v21, %v118_v19 }
  0x1a   :  { %v122_v24 = vadd.f32 %v120_v23, %v119_v22 }
  0x1c   :  { %124 = vst [vmem:[#allocation8] sm:$0xff] %v122_v24 }
  0x1d   :  { %135 = dma.vmem_to_hbm [thread:$0]  %s131_s2, 128, %s133_s30, [#allocation4]  }
  0x1e   :  { %256 = dma.done.wait [#allocation4], 128  }
  0x1f   :  { %257 = vsyncadd [#allocation4], 4294967168 }
  0x20   :  { %140 = vsyncpa [#allocation3], 1 }
  0x21   :  { %141 = vsyncpa [#allocation6], 1 }
  0x22   :  { %142 = vsyncpa [#allocation4], 1 }

</bundles_post_ra>
